<compile_context>
chip_gen: v7x
topology: tpu7x:2x2x1
jax: 0.10.0
libtpu: 0.0.40
codegen_flags: <defaults>
</compile_context>

<pallas_src>
import jax
import jax.numpy as jnp
from jax.experimental import pallas as pl
from jax.experimental.pallas import tpu as pltpu

EMB_DIM = 32


def _next_movie_kernel(u_idx_ref, m_idx_ref,    # scalar-prefetch indices (SMEM)
                       u_tbl_ref, m_tbl_ref,    # full embedding tables (HBM, native dtype)
                       wu_ref, wm_ref,          # (1, 32) split Linear weights (VMEM, resident)
                       b_ref,                   # (1, 1) bias (SMEM)
                       out_ref,                 # (1, TILE) lane-dense output block
                       u_buf, m_buf, sem):      # (TILE, 32) gather scratch + DMA sems
    tile = out_ref.shape[1]
    base = pl.program_id(0) * tile
    # Last tile may be ragged; only gather the valid rows of this tile.
    n_valid = jnp.minimum(tile, u_idx_ref.shape[0] - base)

    def row_copy(j, which):
        # which == 0 -> user table, which == 1 -> movie table (static).
        idx_ref, tbl_ref, buf = ((u_idx_ref, u_tbl_ref, u_buf) if which == 0
                                 else (m_idx_ref, m_tbl_ref, m_buf))
        row = idx_ref[base + j]
        return pltpu.make_async_copy(tbl_ref.at[pl.ds(row, 1), :],
                                     buf.at[pl.ds(j, 1), :],
                                     sem.at[which])

    # Issue every row-gather DMA of this tile before waiting on any of them so
    # many random HBM reads are in flight at once.
    def _start(j, carry):
        row_copy(j, 0).start()
        row_copy(j, 1).start()
        return carry

    jax.lax.fori_loop(0, n_valid, _start, 0)

    # Per-copy waits: one matching decrement per issued copy (safe regardless
    # of whether the DMA semaphore counts bytes or completions).
    def _wait(j, carry):
        row_copy(j, 0).wait()
        row_copy(j, 1).wait()
        return carry

    jax.lax.fori_loop(0, n_valid, _wait, 0)

    # Linear(64, 1) with the concat folded away: split weight, single fused
    # multiply-add + one cross-lane reduce on the VPU/XLU (no MXU).
    u = u_buf[...].astype(jnp.float32)
    m = m_buf[...].astype(jnp.float32)
    scores = jnp.sum(u * wu_ref[...] + m * wm_ref[...], axis=-1) + b_ref[0, 0]
    # Rows >= n_valid hold stale scratch; the wrapper slices those lanes off.
    out_ref[...] = scores.reshape(1, tile)


def my_next_movie_net(users, movies, user_table, movie_table, w, b, *, tile=256):
    """users, movies: int [B]; returns float32 [B, 1] (matches the PyTorch forward)."""
    B = users.shape[0]
    users = users.astype(jnp.int32)
    movies = movies.astype(jnp.int32)

    # Lane-aligned (multiple-of-128) batch tile; don't over-allocate for tiny B.
    tile = int(max(128, min(tile, pl.cdiv(B, 128) * 128)))
    num_tiles = pl.cdiv(B, tile)

    w_flat = jnp.asarray(w, jnp.float32).reshape(2 * EMB_DIM)
    wu = w_flat[:EMB_DIM].reshape(1, EMB_DIM)          # weight for the user half
    wm = w_flat[EMB_DIM:].reshape(1, EMB_DIM)          # weight for the movie half
    b2d = jnp.asarray(b, jnp.float32).reshape(1, 1)

    resident = pl.BlockSpec((1, EMB_DIM), lambda t, u, m: (0, 0))

    out_row = pl.pallas_call(
        _next_movie_kernel,
        out_shape=jax.ShapeDtypeStruct((1, num_tiles * tile), jnp.float32),
        grid_spec=pltpu.PrefetchScalarGridSpec(
            num_scalar_prefetch=2,                     # users, movies -> SMEM
            grid=(num_tiles,),
            in_specs=[
                pl.BlockSpec(memory_space=pl.ANY),     # user table stays in HBM (native dtype)
                pl.BlockSpec(memory_space=pl.ANY),     # movie table stays in HBM (native dtype)
                resident,                              # wu
                resident,                              # wm
                pl.BlockSpec(memory_space=pltpu.MemorySpace.SMEM),   # bias scalar
            ],
            # One fresh lane-dense (1, tile) block per grid step.
            out_specs=pl.BlockSpec((1, tile), lambda t, u, m: (0, t)),
            scratch_shapes=[
                pltpu.VMEM((tile, EMB_DIM), user_table.dtype),
                pltpu.VMEM((tile, EMB_DIM), movie_table.dtype),
                pltpu.SemaphoreType.DMA((2,)),
            ],
        ),
        compiler_params=pltpu.CompilerParams(
            # Each tile is fully independent (own output block, own scratch),
            # so the batch-tile axis can be sharded across TensorCores (v7x).
            dimension_semantics=("parallel",)),
    )(users, movies, user_table, movie_table, wu, wm, b2d)

    return out_row[0, :B].reshape(B, 1)


if __name__ == "__main__":
    key = jax.random.PRNGKey(0)
    k_ut, k_mt, k_w, k_b, k_u, k_m = jax.random.split(key, 6)

    num_users, num_movies, batch = 64, 48, 8

    # Deterministic parameter init mirroring PyTorch defaults:
    #   nn.Embedding -> N(0, 1); nn.Linear -> U(-1/sqrt(fan_in), 1/sqrt(fan_in))
    user_table = jax.random.normal(k_ut, (num_users, EMB_DIM), jnp.float32)
    movie_table = jax.random.normal(k_mt, (num_movies, EMB_DIM), jnp.float32)
    bound = 1.0 / float(EMB_DIM * 2) ** 0.5
    w = jax.random.uniform(k_w, (EMB_DIM * 2, 1), jnp.float32, -bound, bound)
    b = jax.random.uniform(k_b, (1,), jnp.float32, -bound, bound)

    users = jax.random.randint(k_u, (batch,), 0, num_users, jnp.int32)
    movies = jax.random.randint(k_m, (batch,), 0, num_movies, jnp.int32)

    out = my_next_movie_net(users, movies, user_table, movie_table, w, b)
    out = jax.block_until_ready(out)

    # Pure-JAX reference check.
    feat = jnp.concatenate([user_table[users], movie_table[movies]], axis=1)
    ref = feat @ w + b
    assert out.shape == (batch, 1)
    assert jnp.allclose(out, ref, atol=1e-4), (out, ref)

    print("KERNEL_OK")
</pallas_src>

<mosaic_0001>
module attributes {stable_mosaic.version = 11 : i64} {
  func.func @_next_movie_kernel(%arg0: i32, %arg1: memref<8xi32, #tpu.memory_space<smem>>, %arg2: memref<8xi32, #tpu.memory_space<smem>>, %arg3: memref<64x32xf32, #tpu.memory_space<any>>, %arg4: memref<48x32xf32, #tpu.memory_space<any>>, %arg5: memref<1x32xf32, #tpu.memory_space<vmem>>, %arg6: memref<1x32xf32, #tpu.memory_space<vmem>>, %arg7: memref<1x1xf32, #tpu.memory_space<smem>>, %arg8: memref<1x128xf32, #tpu.memory_space<vmem>>, %arg9: memref<128x32xf32, #tpu.memory_space<vmem>>, %arg10: memref<128x32xf32, #tpu.memory_space<vmem>>, %arg11: memref<2x!tpu.dma_semaphore, #tpu.memory_space<semaphore_mem>>) attributes {dimension_semantics = [#tpu.dimension_semantics<parallel>], iteration_bounds = array<i64: 1>, scalar_prefetch = 2 : i64, scratch_operands = 3 : i64, tpu.core_type = #tpu.core_type<tc>, window_params = [{}, {}, {pipeline_mode = #tpu.pipeline_mode<synchronous>, transform_indices = @transform_2, window_bounds = array<i64: 1, 32>}, {pipeline_mode = #tpu.pipeline_mode<synchronous>, transform_indices = @transform_3, window_bounds = array<i64: 1, 32>}, {transform_indices = @transform_4, window_bounds = array<i64: 1, 1>}, {transform_indices = @transform_5, window_bounds = array<i64: 1, 128>}]} {
    %c128_i32 = arith.constant 128 : i32
    %0 = arith.muli %arg0, %c128_i32 : i32
    %c8_i32 = arith.constant 8 : i32
    %1 = arith.subi %c8_i32, %0 : i32
    %c128_i32_0 = arith.constant 128 : i32
    %2 = arith.minsi %c128_i32_0, %1 : i32
    %c0_i32 = arith.constant 0 : i32
    %c0_i32_1 = arith.constant 0 : i32
    %3 = arith.subi %2, %c0_i32_1 : i32
    %4 = arith.addi %c0_i32_1, %3 : i32
    %c1_i32 = arith.constant 1 : i32
    scf.for %arg12 = %c0_i32_1 to %4 step %c1_i32  : i32 {
      %22 = arith.addi %0, %arg12 : i32
      %23 = arith.index_cast %22 : i32 to index
      %24 = memref.load %arg1[%23] : memref<8xi32, #tpu.memory_space<smem>>
      %c0_i32_16 = arith.constant 0 : i32
      %c0_i32_17 = arith.constant 0 : i32
      %25 = tpu.memref_slice %arg3[%24, %c0_i32_17] : memref<64x32xf32, #tpu.memory_space<any>> -> memref<1x32xf32, #tpu.memory_space<any>>
      %c0_i32_18 = arith.constant 0 : i32
      %26 = tpu.memref_slice %arg9[%arg12, %c0_i32_18] : memref<128x32xf32, #tpu.memory_space<vmem>> -> memref<1x32xf32, #tpu.memory_space<vmem>>
      %27 = tpu.memref_slice %arg11[%c0_i32_16] : memref<2x!tpu.dma_semaphore, #tpu.memory_space<semaphore_mem>> -> memref<1x!tpu.dma_semaphore, #tpu.memory_space<semaphore_mem>>
      %28 = tpu.memref_squeeze %27 : memref<1x!tpu.dma_semaphore, #tpu.memory_space<semaphore_mem>> -> memref<!tpu.dma_semaphore, #tpu.memory_space<semaphore_mem>>
      tpu.enqueue_dma source(%25 : memref<1x32xf32, #tpu.memory_space<any>>) target(%26 : memref<1x32xf32, #tpu.memory_space<vmem>>) target_semaphore(%28 : memref<!tpu.dma_semaphore, #tpu.memory_space<semaphore_mem>>)
      %29 = arith.addi %0, %arg12 : i32
      %30 = arith.index_cast %29 : i32 to index
      %31 = memref.load %arg2[%30] : memref<8xi32, #tpu.memory_space<smem>>
      %c1_i32_19 = arith.constant 1 : i32
      %c0_i32_20 = arith.constant 0 : i32
      %32 = tpu.memref_slice %arg4[%31, %c0_i32_20] : memref<48x32xf32, #tpu.memory_space<any>> -> memref<1x32xf32, #tpu.memory_space<any>>
      %c0_i32_21 = arith.constant 0 : i32
      %33 = tpu.memref_slice %arg10[%arg12, %c0_i32_21] : memref<128x32xf32, #tpu.memory_space<vmem>> -> memref<1x32xf32, #tpu.memory_space<vmem>>
      %34 = tpu.memref_slice %arg11[%c1_i32_19] : memref<2x!tpu.dma_semaphore, #tpu.memory_space<semaphore_mem>> -> memref<1x!tpu.dma_semaphore, #tpu.memory_space<semaphore_mem>>
      %35 = tpu.memref_squeeze %34 : memref<1x!tpu.dma_semaphore, #tpu.memory_space<semaphore_mem>> -> memref<!tpu.dma_semaphore, #tpu.memory_space<semaphore_mem>>
      tpu.enqueue_dma source(%32 : memref<1x32xf32, #tpu.memory_space<any>>) target(%33 : memref<1x32xf32, #tpu.memory_space<vmem>>) target_semaphore(%35 : memref<!tpu.dma_semaphore, #tpu.memory_space<semaphore_mem>>)
    }
    %c0_i32_2 = arith.constant 0 : i32
    %c0_i32_3 = arith.constant 0 : i32
    %5 = arith.subi %2, %c0_i32_3 : i32
    %6 = arith.addi %c0_i32_3, %5 : i32
    %c1_i32_4 = arith.constant 1 : i32
    scf.for %arg12 = %c0_i32_3 to %6 step %c1_i32_4  : i32 {
      %22 = arith.addi %0, %arg12 : i32
      %23 = arith.index_cast %22 : i32 to index
      %24 = memref.load %arg1[%23] : memref<8xi32, #tpu.memory_space<smem>>
      %c0_i32_16 = arith.constant 0 : i32
      %c0_i32_17 = arith.constant 0 : i32
      %25 = tpu.memref_slice %arg3[%24, %c0_i32_17] : memref<64x32xf32, #tpu.memory_space<any>> -> memref<1x32xf32, #tpu.memory_space<any>>
      %c0_i32_18 = arith.constant 0 : i32
      %26 = tpu.memref_slice %arg9[%arg12, %c0_i32_18] : memref<128x32xf32, #tpu.memory_space<vmem>> -> memref<1x32xf32, #tpu.memory_space<vmem>>
      %27 = tpu.memref_slice %arg11[%c0_i32_16] : memref<2x!tpu.dma_semaphore, #tpu.memory_space<semaphore_mem>> -> memref<1x!tpu.dma_semaphore, #tpu.memory_space<semaphore_mem>>
      %28 = tpu.memref_squeeze %27 : memref<1x!tpu.dma_semaphore, #tpu.memory_space<semaphore_mem>> -> memref<!tpu.dma_semaphore, #tpu.memory_space<semaphore_mem>>
      tpu.wait_dma2 semaphore(%28 : memref<!tpu.dma_semaphore, #tpu.memory_space<semaphore_mem>>) src(%25 : memref<1x32xf32, #tpu.memory_space<any>>) dst(%26 : memref<1x32xf32, #tpu.memory_space<vmem>>)
      %29 = arith.addi %0, %arg12 : i32
      %30 = arith.index_cast %29 : i32 to index
      %31 = memref.load %arg2[%30] : memref<8xi32, #tpu.memory_space<smem>>
      %c1_i32_19 = arith.constant 1 : i32
      %c0_i32_20 = arith.constant 0 : i32
      %32 = tpu.memref_slice %arg4[%31, %c0_i32_20] : memref<48x32xf32, #tpu.memory_space<any>> -> memref<1x32xf32, #tpu.memory_space<any>>
      %c0_i32_21 = arith.constant 0 : i32
      %33 = tpu.memref_slice %arg10[%arg12, %c0_i32_21] : memref<128x32xf32, #tpu.memory_space<vmem>> -> memref<1x32xf32, #tpu.memory_space<vmem>>
      %34 = tpu.memref_slice %arg11[%c1_i32_19] : memref<2x!tpu.dma_semaphore, #tpu.memory_space<semaphore_mem>> -> memref<1x!tpu.dma_semaphore, #tpu.memory_space<semaphore_mem>>
      %35 = tpu.memref_squeeze %34 : memref<1x!tpu.dma_semaphore, #tpu.memory_space<semaphore_mem>> -> memref<!tpu.dma_semaphore, #tpu.memory_space<semaphore_mem>>
      tpu.wait_dma2 semaphore(%35 : memref<!tpu.dma_semaphore, #tpu.memory_space<semaphore_mem>>) src(%32 : memref<1x32xf32, #tpu.memory_space<any>>) dst(%33 : memref<1x32xf32, #tpu.memory_space<vmem>>)
    }
    %c0 = arith.constant 0 : index
    %c0_5 = arith.constant 0 : index
    %7 = vector.load %arg9[%c0, %c0_5] : memref<128x32xf32, #tpu.memory_space<vmem>>, vector<128x32xf32>
    %c0_6 = arith.constant 0 : index
    %c0_7 = arith.constant 0 : index
    %8 = vector.load %arg10[%c0_6, %c0_7] : memref<128x32xf32, #tpu.memory_space<vmem>>, vector<128x32xf32>
    %c0_8 = arith.constant 0 : index
    %c0_9 = arith.constant 0 : index
    %9 = vector.load %arg5[%c0_8, %c0_9] : memref<1x32xf32, #tpu.memory_space<vmem>>, vector<1x32xf32>
    %10 = vector.broadcast %9 : vector<1x32xf32> to vector<128x32xf32>
    %11 = arith.mulf %7, %10 : vector<128x32xf32>
    %c0_10 = arith.constant 0 : index
    %c0_11 = arith.constant 0 : index
    %12 = vector.load %arg6[%c0_10, %c0_11] : memref<1x32xf32, #tpu.memory_space<vmem>>, vector<1x32xf32>
    %13 = vector.broadcast %12 : vector<1x32xf32> to vector<128x32xf32>
    %14 = arith.mulf %8, %13 : vector<128x32xf32>
    %15 = arith.addf %11, %14 : vector<128x32xf32>
    %cst = arith.constant dense<0.000000e+00> : vector<128xf32>
    %16 = vector.multi_reduction <add>, %15, %cst [1] : vector<128x32xf32> to vector<128xf32>
    %c0_12 = arith.constant 0 : index
    %c0_13 = arith.constant 0 : index
    %17 = memref.load %arg7[%c0_12, %c0_13] : memref<1x1xf32, #tpu.memory_space<smem>>
    %18 = vector.broadcast %17 : f32 to vector<128xf32>
    %19 = arith.addf %16, %18 : vector<128xf32>
    %20 = vector.shape_cast %19 : vector<128xf32> to vector<1x128xf32>
    %c0_14 = arith.constant 0 : index
    %c0_15 = arith.constant 0 : index
    %21 = vector.load %arg8[%c0_14, %c0_15] : memref<1x128xf32, #tpu.memory_space<vmem>>, vector<1x128xf32>
    tpu.vector_store %arg8[%c0_14, %c0_15], %20 {strides = array<i32>} : memref<1x128xf32, #tpu.memory_space<vmem>>, vector<1x128xf32>,
    return
  }
  func.func @transform_2(%arg0: i32, %arg1: memref<8xi32, #tpu.memory_space<smem>>, %arg2: memref<8xi32, #tpu.memory_space<smem>>) -> (i32, i32) {
    %c0_i32 = arith.constant 0 : i32
    %c0_i32_0 = arith.constant 0 : i32
    %c0_i32_1 = arith.constant 0 : i32
    return %c0_i32, %c0_i32_0 : i32, i32
  }
  func.func @transform_3(%arg0: i32, %arg1: memref<8xi32, #tpu.memory_space<smem>>, %arg2: memref<8xi32, #tpu.memory_space<smem>>) -> (i32, i32) {
    %c0_i32 = arith.constant 0 : i32
    %c0_i32_0 = arith.constant 0 : i32
    %c0_i32_1 = arith.constant 0 : i32
    return %c0_i32, %c0_i32_0 : i32, i32
  }
  func.func @transform_4(%arg0: i32, %arg1: memref<8xi32, #tpu.memory_space<smem>>, %arg2: memref<8xi32, #tpu.memory_space<smem>>) -> (i32, i32) {
    %c0_i32 = arith.constant 0 : i32
    %c0_i32_0 = arith.constant 0 : i32
    %c0_i32_1 = arith.constant 0 : i32
    return %c0_i32, %c0_i32_0 : i32, i32
  }
  func.func @transform_5(%arg0: i32, %arg1: memref<8xi32, #tpu.memory_space<smem>>, %arg2: memref<8xi32, #tpu.memory_space<smem>>) -> (i32, i32) {
    %c0_i32 = arith.constant 0 : i32
    %c0_i32_0 = arith.constant 0 : i32
    return %c0_i32, %arg0 : i32, i32
  }
}

</mosaic_0001>

<bundles_post_ra>
// kernel: tpu_custom_call.1
= control target key start
LH: loop header
LB: loop body
LE: loop exit
PB: predicated region body
PF: predicated region fallthrough
CT: control target
= control target key end

     0   :  { %s777_s0 = inlined_call_operand.vmem [shape: s32[8], index: 0, kind: input, shape index: {}]   ;;  %s778_s2 = inlined_call_operand.vmem [shape: f32[64,32], index: 2, kind: input, shape index: {}]   ;;  %s779_s3 = inlined_call_operand.vmem [shape: f32[48,32], index: 3, kind: input, shape index: {}]   ;;  %s780_s4 = inlined_call_operand.vmem [shape: f32[1,32], index: 4, kind: input, shape index: {}]   ;;  %s781_s5 = inlined_call_operand.vmem [shape: f32[1,32], index: 5, kind: input, shape index: {}]   ;;  %s782_s7 = inlined_call_operand.hbm [shape: f32[1,128], index: 7, kind: output, shape index: {}]   ;;  %s783_s1 = inlined_call_operand.vmem [shape: s32[8], index: 1, kind: input, shape index: {}]   ;;  %s784_s6 = inlined_call_operand.<no memory space> [shape: f32[1,1], index: 6, kind: input, shape index: {}]  }
   0x1   :  { %s12_s26 = sshll.u32 %s777_s0, 4  ;;  %s16_s29 = sshll.u32 %s783_s1, 4  ;;  %s13_s26 = int_to_ptr.vmem [resolvable:$true] %s12_s26  ;;  %s17_s29 = int_to_ptr.vmem [resolvable:$true] %s16_s29 }
   0x2   :  { %s525_s30 = scalar_lea.vmem %s13_s26, 16  ;;  %p530_p1 = scmp.lt.s32.totalorder %s13_s26, %s13_s26 }
   0x3   :  { %p526_p0 = scmp.ne.s32.totalorder %s13_s26, %s525_s30  ;;  %p531_p2 = scmp.lt.s32.totalorder %s525_s30, %s525_s30 }
   0x5   :  { %p532_p3 = por %p531_p2, %p530_p1 }
   0x7   :  { %p533_p4 = pnand %p532_p3, %p526_p0 }
   0x9   :  { %536 = shalt.err (!%p533_p4)  }
   0xa   :  { %s595_s8 = smov [#allocation6]   ;;  %s537_s9 = scalar_lea.vmem %s17_s29, 16 }
   0xb   :  { %15 = dma.vmem_to_smem %s13_s26, 16, %s595_s8, [#allocation5] }
   0xc   :  { %p538_p5 = scmp.ne.s32.totalorder %s17_s29, %s537_s9  ;;  %p542_p6 = scmp.lt.s32.totalorder %s17_s29, %s17_s29 }
   0xd   :  { %p543_p7 = scmp.lt.s32.totalorder %s537_s9, %s537_s9 }
   0xf   :  { %p544_p8 = por %p543_p7, %p542_p6 }
  0x11   :  { %p545_p9 = pnand %p544_p8, %p538_p5 }
  0x13   :  { %548 = shalt.err (!%p545_p9)  }
  0x14   :  { %s596_s0 = smov [#allocation7]   ;;  %20 = sst [smem:[#allocation8]] %s784_s6 }
  0x15   :  { %19 = dma.vmem_to_smem %s17_s29, 16, %s596_s0, [#allocation5] }
  0x16   :  { %579 = dma.done.wait [#allocation5], 32 }
  0x17   :  { %580 = vsyncadd [#allocation5], 4294967264 }
  0x18   :  { %22 = sfence }
  0x19   :  { %23 = vsyncpa [#allocation10], 0  ;;  %s587_s11 = smov 0  }
  0x1a LB: > { %s41_s12 = sld [smem:[#allocation6 + %s589_s11]]  ;;  %s43_s16 = scalar_lea.vmem [#allocation2], %s589_s11  ;;  %s589_s11 = sphi %s587_s11, %s37_s11  }
  0x20   : > { %s42_s15 = scalar_lea.vmem %s778_s2, %s41_s12 }
  0x21   : > { %v61_v0 = vld [vmem:[%s42_s15] sm:$0x1] }
  0x22   : > { %62 = vst [vmem:[%s43_s16] sm:$0x1] %v61_v0 }
  0x23   : > { %87 = vsyncadd [#allocation4], 16  ;;  %s88_s17 = sld [smem:[#allocation7 + %s589_s11]]  ;;  %s90_s20 = scalar_lea.vmem [#allocation3], %s589_s11 }
  0x29   : > { %s89_s19 = scalar_lea.vmem %s779_s3, %s88_s17 }
  0x2a   : > { %v109_v1 = vld [vmem:[%s89_s19] sm:$0x1] }
  0x2b   : > { %110 = vst [vmem:[%s90_s20] sm:$0x1] %v109_v1 }
  0x2c   : > { %135 = vsyncadd [#allocation4 + $0x1], 16  ;;  %s37_s11 = sadd.s32 1, %s589_s11  }
  0x2d   : > { %p36_p10 = scmp.ge.s32.totalorder %s37_s11, 8 }
  0x2e   :  { %s591_s21 = smov (%p36_p10), 0  }
  0x2f   :  { %39 = sbr.rel (!%p36_p10) target bundleno = 26 (0x1a), region = 133 }
  0x36 LB: > { %581 = dma.done.wait [#allocation4], 16  ;;  %s593_s21 = sphi %s591_s21, %s139_s21  }
  0x37   : > { %582 = vsyncadd [#allocation4], 4294967280 }
  0x38   : > { %583 = dma.done.wait [#allocation4 + $0x1], 16 }
  0x39   : > { %584 = vsyncadd [#allocation4 + $0x1], 4294967280  ;;  %s139_s21 = sadd.s32 1, %s593_s21  }
  0x3a   : > { %p138_p11 = scmp.ge.s32.totalorder %s139_s21, 8 }
  0x3b   :  { %v151_v2 = vld [vmem:[#allocation2] sm:$0xff] (%p138_p11)  ;;  %v153_v7 = vld [vmem:[#allocation2 + $0x10] sm:$0xff] (%p138_p11)  ;;  %v152_v12 = vld [vmem:[#allocation2 + $0x8] sm:$0xff] (%p138_p11)  ;;  %vm245_vm0 = vcmask (%p138_p11), 261120   ;;  %vm339_vm1 = vcmask (%p138_p11), 130112   ;;  %vm346_vm2 = vcmask (%p138_p11), 195712  }
  0x3c   :  { %141 = sbr.rel (!%p138_p11) target bundleno = 54 (0x36), region = 144  ;;  %v167_v3 = vld [vmem:[#allocation3] sm:$0xff] (%p138_p11)  ;;  %v169_v8 = vld [vmem:[#allocation3 + $0x10] sm:$0xff] (%p138_p11)  ;;  %v168_v13 = vld [vmem:[#allocation3 + $0x8] sm:$0xff] (%p138_p11)  ;;  %vm353_vm3 = vcmask (%p138_p11), 261312   ;;  %vm360_vm4 = vcmask (%p138_p11), 326912  }
  0x3d   :  { %v656_v4 = vld [vmem:[%s780_s4] ss:$0 sm:$0xff] (%p138_p11)  ;;  %v154_v14 = vld [vmem:[#allocation2 + $0x18] sm:$0xff] (%p138_p11)  ;;  %v156_v25 = vld [vmem:[#allocation2 + $0x28] sm:$0xff] (%p138_p11)  ;;  %s294_s4 = sld [smem:[#allocation8]] (%p138_p11)  ;;  %vm367_vm5 = vcmask (%p138_p11), 392512  }
  0x3e   :  { %v190_v5 = vmul.f32 (%p138_p11), %v656_v4, %v151_v2  ;;  %v662_v6 = vld [vmem:[%s781_s5] ss:$0 sm:$0xff] (%p138_p11)  ;;  %v192_v10 = vmul.f32 (%p138_p11), %v656_v4, %v153_v7  ;;  %v191_v15 = vmul.f32 (%p138_p11), %v656_v4, %v152_v12  ;;  %v170_v17 = vld [vmem:[#allocation3 + $0x18] sm:$0xff] (%p138_p11)  ;;  %v193_v18 = vmul.f32 (%p138_p11), %v656_v4, %v154_v14  ;;  %v172_v26 = vld [vmem:[#allocation3 + $0x28] sm:$0xff] (%p138_p11)  ;;  %s597_s5 = smov (%p138_p11), [#allocation9]  }
  0x3f   :  { %v213_v9 = vmul.f32 (%p138_p11), %v662_v6, %v167_v3  ;;  %v215_v11 = vmul.f32 (%p138_p11), %v662_v6, %v169_v8  ;;  %v214_v16 = vmul.f32 (%p138_p11), %v662_v6, %v168_v13  ;;  %v155_v19 = vld [vmem:[#allocation2 + $0x20] sm:$0xff] (%p138_p11)  ;;  %v216_v23 = vmul.f32 (%p138_p11), %v662_v6, %v170_v17  ;;  %v157_v27 = vld [vmem:[#allocation2 + $0x30] sm:$0xff] (%p138_p11)  ;;  %v158_v33 = vld [vmem:[#allocation2 + $0x38] sm:$0xff] (%p138_p11)  ;;  %s447_s24 = sshll.u32 (%p138_p11), %s597_s5, 4  ;;  %s448_s24 = int_to_ptr.vmem [resolvable:$true] %s447_s24 }
  0x40   :  { %v171_v20 = vld [vmem:[#allocation3 + $0x20] sm:$0xff] (%p138_p11)  ;;  %v194_v24 = vmul.f32 (%p138_p11), %v656_v4, %v155_v19  ;;  %v195_v30 = vmul.f32 (%p138_p11), %v656_v4, %v156_v25  ;;  %v218_v31 = vmul.f32 (%p138_p11), %v662_v6, %v172_v26  ;;  %v173_v32 = vld [vmem:[#allocation3 + $0x30] sm:$0xff] (%p138_p11)  ;;  %v174_v34 = vld [vmem:[#allocation3 + $0x38] sm:$0xff] (%p138_p11)  ;;  %v196_v40 = vmul.f32 (%p138_p11), %v656_v4, %v157_v27  ;;  %s549_s25 = scalar_lea.vmem (%p138_p11), %s448_s24, 16  ;;  %s553_s26 = scalar_lea.vmem (%p138_p11), %s448_s24, 32 }
  0x41   :  { %v229_v21 = vadd.f32 (%p138_p11), %v213_v9, %v190_v5  ;;  %v231_v22 = vadd.f32 (%p138_p11), %v215_v11, %v192_v10  ;;  %v230_v28 = vadd.f32 (%p138_p11), %v214_v16, %v191_v15  ;;  %v217_v29 = vmul.f32 (%p138_p11), %v662_v6, %v171_v20  ;;  %v159_v46 = vld [vmem:[#allocation2 + $0x40] sm:$0xff] (%p138_p11)  ;;  %v160_v48 = vld [vmem:[#allocation2 + $0x48] sm:$0xff] (%p138_p11)  ;;  %v161_v58 = vld [vmem:[#allocation2 + $0x50] sm:$0xff] (%p138_p11)  ;;  %p550_p12 = scmp.ne.s32.totalorder (%p138_p11), %s448_s24, %s549_s25  ;;  %p554_p13 = scmp.lt.s32.totalorder (%p138_p11), %s448_s24, %s448_s24 }
  0x42   :  { %v232_v37 = vadd.f32 (%p138_p11), %v216_v23, %v193_v18  ;;  %v219_v41 = vmul.f32 (%p138_p11), %v662_v6, %v173_v32  ;;  %v234_v43 = vadd.f32 (%p138_p11), %v218_v31, %v195_v30  ;;  %v197_v44 = vmul.f32 (%p138_p11), %v656_v4, %v158_v33  ;;  %v175_v47 = vld [vmem:[#allocation3 + $0x40] sm:$0xff] (%p138_p11)  ;;  %v176_v49 = vld [vmem:[#allocation3 + $0x48] sm:$0xff] (%p138_p11)  ;;  %v177_v59 = vld [vmem:[#allocation3 + $0x50] sm:$0xff] (%p138_p11)  ;;  %p555_p0 = scmp.lt.s32.totalorder (%p138_p11), %s553_s26, %s549_s25 }
  0x43   :  { %v246_v35 = vsel %vm245_vm0, %v229_v21, 0.0  ;;  %v252_v36 = vsel %vm245_vm0, %v231_v22, 0.0  ;;  %v249_v38 = vsel %vm245_vm0, %v230_v28, 0.0  ;;  %v233_v39 = vadd.f32 %v217_v29, %v194_v24  ;;  %v162_v60 = vld [vmem:[#allocation2 + $0x58] sm:$0xff]  ;;  %v163_v8 = vld [vmem:[#allocation2 + $0x60] sm:$0xff]  ;;  %v164_v10 = vld [vmem:[#allocation2 + $0x68] sm:$0xff] }
  0x44   :  { %247 = vadd.xlane.f32.xlu0 %v246_v35  ;;  %253 = vadd.xlane.f32.xlu1 %v252_v36  ;;  %v255_v42 = vsel %vm245_vm0, %v232_v37, 0.0  ;;  %v220_v45 = vmul.f32 %v662_v6, %v174_v34  ;;  %v235_v51 = vadd.f32 %v219_v41, %v196_v40  ;;  %v198_v52 = vmul.f32 %v656_v4, %v159_v46  ;;  %v178_v61 = vld [vmem:[#allocation3 + $0x58] sm:$0xff]  ;;  %v179_v9 = vld [vmem:[#allocation3 + $0x60] sm:$0xff]  ;;  %v180_v11 = vld [vmem:[#allocation3 + $0x68] sm:$0xff]  ;;  %p556_p1 = por %p555_p0, %p554_p13 }
  0x45   :  { %v258_v50 = vsel %vm245_vm0, %v233_v39, 0.0  ;;  %v221_v53 = vmul.f32 %v662_v6, %v175_v47  ;;  %v261_v54 = vsel %vm245_vm0, %v234_v43, 0.0  ;;  %v199_v56 = vmul.f32 %v656_v4, %v160_v48  ;;  %v165_v20 = vld [vmem:[#allocation2 + $0x70] sm:$0xff]  ;;  %v166_v22 = vld [vmem:[#allocation2 + $0x78] sm:$0xff] }
  0x46   :  { %v236_v55 = vadd.f32 %v220_v45, %v197_v44  ;;  %v222_v57 = vmul.f32 %v662_v6, %v176_v49  ;;  %v264_v62 = vsel %vm245_vm0, %v235_v51, 0.0  ;;  %v200_v0 = vmul.f32 %v656_v4, %v161_v58  ;;  %v181_v21 = vld [vmem:[#allocation3 + $0x70] sm:$0xff]  ;;  %v182_v23 = vld [vmem:[#allocation3 + $0x78] sm:$0xff]  ;;  %p557_p2 = pnand %p556_p1, %p550_p12 }
  0x47   :  { %v237_v63 = vadd.f32 %v221_v53, %v198_v52  ;;  %v223_v1 = vmul.f32 %v662_v6, %v177_v59  ;;  %v201_v5 = vmul.f32 %v656_v4, %v162_v60  ;;  %v224_v7 = vmul.f32 %v662_v6, %v178_v61 }
  0x48   :  { %250 = vadd.xlane.f32.xlu0 %v249_v38  ;;  %256 = vadd.xlane.f32.xlu1 %v255_v42  ;;  %v267_v2 = vsel %vm245_vm0, %v236_v55, 0.0  ;;  %v238_v3 = vadd.f32 %v222_v57, %v199_v56  ;;  %v202_v14 = vmul.f32 %v656_v4, %v163_v8  ;;  %v225_v15 = vmul.f32 %v662_v6, %v179_v9 }
  0x49   :  { %v270_v12 = vsel %vm245_vm0, %v237_v63, 0.0  ;;  %v239_v13 = vadd.f32 %v223_v1, %v200_v0  ;;  %v240_v17 = vadd.f32 %v224_v7, %v201_v5  ;;  %v203_v18 = vmul.f32 %v656_v4, %v164_v10 }
  0x4a   :  { %v273_v16 = vsel %vm245_vm0, %v238_v3, 0.0  ;;  %v226_v19 = vmul.f32 %v662_v6, %v180_v11  ;;  %v241_v25 = vadd.f32 %v225_v15, %v202_v14  ;;  %v204_v26 = vmul.f32 %v656_v4, %v165_v20 }
  0x4b   :  { %v276_v24 = vsel %vm245_vm0, %v239_v13, 0.0  ;;  %v227_v27 = vmul.f32 %v662_v6, %v181_v21  ;;  %v279_v28 = vsel %vm245_vm0, %v240_v17, 0.0  ;;  %v205_v30 = vmul.f32 %v656_v4, %v166_v22 }
  0x4c   :  { %259 = vadd.xlane.f32.xlu0 %v258_v50  ;;  %262 = vadd.xlane.f32.xlu1 %v261_v54  ;;  %v242_v29 = vadd.f32 %v226_v19, %v203_v18  ;;  %v228_v31 = vmul.f32 %v662_v6, %v182_v23  ;;  %v282_v32 = vsel %vm245_vm0, %v241_v25, 0.0  ;;  %v328_v4 = vlaneseq }
  0x4d   :  { %v243_v34 = vadd.f32 %v227_v27, %v204_v26  ;;  %v717_v41 = vstv %s294_s4  ;;  %vm374_vm6 = vcmask 458112   ;;  %vm381_vm7 = vcmask 523712  }
  0x4e   :  { %v285_v33 = vsel %vm245_vm0, %v242_v29, 0.0  ;;  %v244_v35 = vadd.f32 %v228_v31, %v205_v30  ;;  %v711_v38 = vand.u32 127, %v328_v4  ;;  %v713_v6 = vshrl.u32 %v328_v4, 7 }
  0x4f   :  { %v288_v36 = vsel %vm245_vm0, %v243_v34, 0.0  ;;  %vm388_vm8 = vcmask 589312   ;;  %vm395_vm9 = vcmask 654912   ;;  %vm402_vm10 = vcmask 720512  }
  0x50   :  { %265 = vadd.xlane.f32.xlu0 %v264_v62  ;;  %268 = vadd.xlane.f32.xlu1 %v267_v2  ;;  %v291_v37 = vsel %vm245_vm0, %v244_v35, 0.0  ;;  %v334_v39 = vadd.s32 4294967288, %v711_v38  ;;  %v348_v40 = vadd.s32 4294967272, %v711_v38  ;;  %v341_v43 = vadd.s32 4294967280, %v711_v38 }
  0x51   :  { %v355_v45 = vadd.s32 4294967264, %v711_v38  ;;  %v332_v46 = vsub.s32 %v711_v38, %v713_v6  ;;  %v362_v54 = vadd.s32 4294967256, %v711_v38  ;;  %v369_v61 = vadd.s32 4294967248, %v711_v38 }
  0x52   :  { %v337_v48 = vsub.s32 %v334_v39, %v713_v6  ;;  %v351_v49 = vsub.s32 %v348_v40, %v713_v6  ;;  %v344_v50 = vsub.s32 %v341_v43, %v713_v6  ;;  %v376_v2 = vadd.s32 4294967240, %v711_v38 }
  0x53   :  { %v358_v57 = vsub.s32 %v355_v45, %v713_v6  ;;  %v365_v0 = vsub.s32 %v362_v54, %v713_v6  ;;  %v372_v11 = vsub.s32 %v369_v61, %v713_v6  ;;  %v390_v17 = vadd.s32 4294967224, %v711_v38 }
  0x54   :  { %271 = vadd.xlane.f32.xlu0 %v270_v12  ;;  %274 = vadd.xlane.f32.xlu1 %v273_v16  ;;  %v383_v12 = vadd.s32 4294967232, %v711_v38  ;;  %v379_v15 = vsub.s32 %v376_v2, %v713_v6  ;;  %v397_v23 = vadd.s32 4294967216, %v711_v38  ;;  %v404_v29 = vadd.s32 4294967208, %v711_v38 }
  0x55   :  { %v393_v27 = vsub.s32 %v390_v17, %v713_v6  ;;  %v411_v35 = vadd.s32 4294967200, %v711_v38  ;;  %vm409_vm11 = vcmask 786112   ;;  %vm416_vm12 = vcmask 851712  }
  0x56   :  { %v386_v22 = vsub.s32 %v383_v12, %v713_v6  ;;  %v400_v34 = vsub.s32 %v397_v23, %v713_v6  ;;  %v407_v39 = vsub.s32 %v404_v29, %v713_v6  ;;  %vm423_vm13 = vcmask 917312  }
  0x57   :  { %vm430_vm14 = vcmask 982912   ;;  %vm437_vm15 = vcmask 1048512  }
  0x58   :  { %277 = vadd.xlane.f32.xlu0 %v276_v24  ;;  %280 = vadd.xlane.f32.xlu1 %v279_v28 }
  0x5c   :  { %283 = vadd.xlane.f32.xlu0 %v282_v32  ;;  %286 = vadd.xlane.f32.xlu1 %v285_v33 }
  0x60   :  { %289 = vadd.xlane.f32.xlu0 %v288_v36  ;;  %292 = vadd.xlane.f32.xlu1 %v291_v37 }
  0xd1   :  { %v248_v42 = vpop.xlane.xlu0 %247  ;;  %v254_v44 = vpop.xlane.xlu1 %253 }
  0xd2   :  { %v296_v47 = vadd.f32 %v717_v41, %v248_v42  ;;  %v298_v51 = vadd.f32 %v717_v41, %v254_v44  ;;  %v418_v42 = vadd.s32 4294967192, %v711_v38 }
  0xd4   :  { %v333_v58 = vrot.slane %v296_v47, %v332_v46  ;;  %v345_v62 = vrot.slane %v298_v51, %v344_v50  ;;  %v414_v47 = vsub.s32 %v411_v35, %v713_v6 }
  0xd5   :  { %v251_v52 = vpop.xlane.xlu0 %250  ;;  %v257_v53 = vpop.xlane.xlu1 %256 }
  0xd6   :  { %v297_v55 = vadd.f32 %v717_v41, %v251_v52  ;;  %v299_v56 = vadd.f32 %v717_v41, %v257_v53  ;;  %v421_v53 = vsub.s32 %v418_v42, %v713_v6 }
  0xd8   :  { %v338_v59 = vrot.slane %v297_v55, %v337_v48  ;;  %v352_v60 = vrot.slane %v299_v56, %v351_v49  ;;  %v425_v48 = vadd.s32 4294967184, %v711_v38  ;;  %v432_v49 = vadd.s32 4294967176, %v711_v38 }
  0xd9   :  { %v260_v63 = vpop.xlane.xlu0 %259  ;;  %v263_v1 = vpop.xlane.xlu1 %262 }
  0xda   :  { %v340_v3 = vsel %vm339_vm1, %v338_v59, %v333_v58  ;;  %v300_v5 = vadd.f32 %v717_v41, %v260_v63  ;;  %v301_v7 = vadd.f32 %v717_v41, %v263_v1  ;;  %v428_v59 = vsub.s32 %v425_v48, %v713_v6 }
  0xdb   :  { %v347_v8 = vsel %vm346_vm2, %v345_v62, %v340_v3 }
  0xdc   :  { %v354_v9 = vsel %vm353_vm3, %v352_v60, %v347_v8  ;;  %v359_v10 = vrot.slane %v300_v5, %v358_v57  ;;  %v366_v13 = vrot.slane %v301_v7, %v365_v0  ;;  %v435_v60 = vsub.s32 %v432_v49, %v713_v6 }
  0xdd   :  { %v266_v14 = vpop.xlane.xlu0 %265  ;;  %v269_v16 = vpop.xlane.xlu1 %268 }
  0xde   :  { %v361_v18 = vsel %vm360_vm4, %v359_v10, %v354_v9  ;;  %v302_v19 = vadd.f32 %v717_v41, %v266_v14  ;;  %v303_v20 = vadd.f32 %v717_v41, %v269_v16 }
  0xdf   :  { %v368_v24 = vsel %vm367_vm5, %v366_v13, %v361_v18 }
  0xe0   :  { %v373_v21 = vrot.slane %v302_v19, %v372_v11  ;;  %v380_v25 = vrot.slane %v303_v20, %v379_v15 }
  0xe1   :  { %v272_v26 = vpop.xlane.xlu0 %271  ;;  %v275_v28 = vpop.xlane.xlu1 %274 }
  0xe2   :  { %v375_v30 = vsel %vm374_vm6, %v373_v21, %v368_v24  ;;  %v304_v31 = vadd.f32 %v717_v41, %v272_v26  ;;  %v305_v32 = vadd.f32 %v717_v41, %v275_v28 }
  0xe3   :  { %v382_v36 = vsel %vm381_vm7, %v380_v25, %v375_v30 }
  0xe4   :  { %v387_v33 = vrot.slane %v304_v31, %v386_v22  ;;  %v394_v37 = vrot.slane %v305_v32, %v393_v27 }
  0xe5   :  { %v278_v4 = vpop.xlane.xlu0 %277  ;;  %v281_v40 = vpop.xlane.xlu1 %280 }
  0xe6   :  { %v389_v43 = vsel %vm388_vm8, %v387_v33, %v382_v36  ;;  %v306_v44 = vadd.f32 %v717_v41, %v278_v4  ;;  %v307_v45 = vadd.f32 %v717_v41, %v281_v40 }
  0xe7   :  { %v396_v50 = vsel %vm395_vm9, %v394_v37, %v389_v43 }
  0xe8   :  { %v401_v46 = vrot.slane %v306_v44, %v400_v34  ;;  %v408_v51 = vrot.slane %v307_v45, %v407_v39 }
  0xe9   :  { %v284_v52 = vpop.xlane.xlu0 %283  ;;  %v287_v54 = vpop.xlane.xlu1 %286 }
  0xea   :  { %v403_v55 = vsel %vm402_vm10, %v401_v46, %v396_v50  ;;  %v308_v56 = vadd.f32 %v717_v41, %v284_v52  ;;  %v309_v57 = vadd.f32 %v717_v41, %v287_v54 }
  0xeb   :  { %v410_v61 = vsel %vm409_vm11, %v408_v51, %v403_v55 }
  0xec   :  { %v415_v58 = vrot.slane %v308_v56, %v414_v47  ;;  %v422_v38 = vrot.slane %v309_v57, %v421_v53 }
  0xed   :  { %v290_v62 = vpop.xlane.xlu0 %289  ;;  %v293_v63 = vpop.xlane.xlu1 %292 }
  0xee   :  { %v417_v0 = vsel %vm416_vm12, %v415_v58, %v410_v61  ;;  %v310_v1 = vadd.f32 %v717_v41, %v290_v62  ;;  %v311_v2 = vadd.f32 %v717_v41, %v293_v63 }
  0xef   :  { %v424_v7 = vsel %vm423_vm13, %v422_v38, %v417_v0 }
  0xf0   :  { %v429_v3 = vrot.slane %v310_v1, %v428_v59  ;;  %v436_v5 = vrot.slane %v311_v2, %v435_v60 }
  0xf2   :  { %v431_v8 = vsel %vm430_vm14, %v429_v3, %v424_v7 }
  0xf3   :  { %v438_v6 = vsel %vm437_vm15, %v436_v5, %v431_v8 }
  0xf4   :  { %440 = vst [vmem:[#allocation9] sm:$0x1] %v438_v6 }
  0xf5   :  { %560 = shalt.err (!%p557_p2)
}
  0xf6   :  { %s561_s29 = scalar_lea.hbm %s782_s7, 16 }
  0xf7   :  { %p562_p3 = scmp.ne.s32.totalorder %s782_s7, %s561_s29  ;;  %p565_p4 = scmp.lt.u32.totalorder %s561_s29, %s782_s7 }
  0xf9   :  { %p567_p5 = pnand %p565_p4, %p562_p3 }
  0xfb   :  { %570 = shalt.err (!%p567_p5)
}
  0xfc   :  { %450 = dma.vmem_to_hbm [thread:$0]  %s448_s24, 16, %s782_s7, [#allocation10]  }
  0xfd   :  { %585 = dma.done.wait [#allocation10], 16  }
  0xfe   :  { %586 = vsyncadd [#allocation10], 4294967280 }
  0xff   :  { %454 = vsyncpa [#allocation10], 1 }
 0x100   :  { %455 = vsyncmov [#allocation4] }
 0x103   :  { %s456_s11 = vpop.sfrf %455 }
 0x104   :  { %p504_p6 = scmp.ne.s32.totalorder %s456_s11, 0 }
 0x106   :  { %460 = shalt.err (%p504_p6)  }
 0x107   :  { %462 = vsyncmov [#allocation4 + $0x1] }
 0x10a   :  { %s463_s12 = vpop.sfrf %462 }
 0x10b   :  { %p505_p7 = scmp.ne.s32.totalorder %s463_s12, 0 }
 0x10d   :  { %467 = shalt.err (%p505_p7)  }

</bundles_post_ra>
